<compile_context>
chip_gen: v7x
topology: tpu7x:2x2x1
jax: 0.10.0
libtpu: 0.0.40
codegen_flags: <defaults>
</compile_context>

<pallas_src>
import jax
import jax.numpy as jnp
from jax.experimental import pallas as pl
from jax.experimental.pallas import tpu as pltpu


def _lm_head_kernel(x_ref, wd_ref, bd_ref, g_ref, be_ref, wo_ref, bo_ref,
                    out_ref, h_ref):
    # x_ref:  [TM, E]  bf16 row tile of flattened features
    # wd_ref: [E, E]   bf16 dense weight, pre-transposed to [in, out]
    # bd_ref: [1, E]   f32 dense bias
    # g_ref:  [1, E]   f32 layernorm gamma
    # be_ref: [1, E]   f32 layernorm beta
    # wo_ref: [E, TV]  bf16 vocab-weight tile, pre-transposed to [in, out]
    # bo_ref: [1, TV]  f32 vocab-bias tile
    # out_ref:[TM, TV] logits tile (default bf16)
    # h_ref:  [TM, E]  bf16 scratch: cached dense+gelu+LN output for this row tile
    j = pl.program_id(1)

    @pl.when(j == 0)
    def _compute_hidden():
        x = x_ref[...]                                            # bf16 [TM, E]
        # dense: x @ W_dense^T (weights pre-transposed), f32 accumulate on MXU
        h = jnp.dot(x, wd_ref[...], preferred_element_type=jnp.float32)
        h = h + bd_ref[...]
        # exact erf-based gelu (torch F.gelu default), f32 elementwise
        h = 0.5 * h * (1.0 + jax.lax.erf(h * 0.7071067811865476))
        # layernorm over last dim, eps = 1e-5, affine
        mu = jnp.mean(h, axis=-1, keepdims=True)
        var = jnp.mean((h - mu) * (h - mu), axis=-1, keepdims=True)
        h = (h - mu) * jax.lax.rsqrt(var + 1e-5)
        h = h * g_ref[...] + be_ref[...]
        h_ref[...] = h.astype(h_ref.dtype)        # cache bf16 for vocab matmuls

    # vocab projection for this (row tile, vocab tile): h @ W_out^T + b_out
    logits = jnp.dot(h_ref[...], wo_ref[...], preferred_element_type=jnp.float32)
    logits = logits + bo_ref[...]
    out_ref[...] = logits.astype(out_ref.dtype)


def _round_up(x, m):
    return (x + m - 1) // m * m


def _auto_config():
    """Pick (tm, tv, vmem_limit_bytes, two_tc) from the chip's VMEM capacity."""
    vmem_bytes = 64 * 1024 * 1024  # conservative fallback (v7x-sized)
    try:
        vmem_bytes = int(pltpu.get_tpu_info().vmem_capacity_bytes)
    except Exception:
        pass
    if vmem_bytes >= 96 * 1024 * 1024:
        # v5e / v6e: 128 MiB physical VMEM, single TensorCore per chip.
        return 1024, 2048, 96 * 1024 * 1024, False
    # v7x: 64 MiB physical VMEM, 2 TensorCores per chip.
    return 512, 2048, 40 * 1024 * 1024, True


def _resident_spec(shape):
    """Grid-invariant operand (constant index_map): single-buffer to save VMEM."""
    index_map = lambda i, j: (0,) * len(shape)
    try:
        return pl.BlockSpec(shape, index_map, pipeline_mode=pl.Buffered(1))
    except TypeError:  # older JAX without pipeline_mode kwarg
        return pl.BlockSpec(shape, index_map)


def roberta_lm_head(features, w_dense, b_dense, ln_gamma, ln_beta, w_out, b_out,
                    *, tm=None, tv=None, out_dtype=jnp.bfloat16,
                    vmem_limit_bytes=None, wo_buffers=None):
    """RobertaLMHead forward (masked_tokens=None path).

    features: [B, T, E]
    w_dense:  [E, E]   (torch [out, in] layout)
    w_out:    [V, E]   (torch [out, in] layout)
    Returns [B, T, V] logits in `out_dtype` (default bf16; pass jnp.float32 for
    the slower full-precision-output path).
    """
    B, T, E = features.shape
    V = w_out.shape[0]
    N = B * T

    auto_tm, auto_tv, auto_vmem, two_tc = _auto_config()
    tm = auto_tm if tm is None else tm
    tv = auto_tv if tv is None else tv
    vmem_limit_bytes = auto_vmem if vmem_limit_bytes is None else vmem_limit_bytes

    # Clamp tiles to the (padded) problem.  Row tile multiple of 8, vocab tile
    # multiple of 128 (the big defaults are 256-aligned for the v6e/v7x MXU).
    tm = min(tm, _round_up(N, 8))
    tv = min(tv, _round_up(V, 128))
    if two_tc and N >= 16:
        # Keep >= 2 row tiles so the "parallel" axis can shard across both TCs.
        tm = min(tm, _round_up((N + 1) // 2, 8))

    n_pad = _round_up(N, tm)
    v_pad = _round_up(V, tv)

    # bf16 MXU operands (no-op casts if the model already stores bf16),
    # f32 accumulation inside the kernel.
    x2d = features.reshape(N, E).astype(jnp.bfloat16)
    # Pre-transpose both weights ONCE to [in, out]: the kernel contracts on
    # dim 0 of the RHS (no per-tile XLU transpose) and streamed W_out tiles
    # are lane-dense along the vocab/output dim.
    wd_t = w_dense.astype(jnp.bfloat16).T          # [E, E]
    wo_t = w_out.astype(jnp.bfloat16).T            # [E, V]
    bd = b_dense.reshape(1, E).astype(jnp.float32)
    g = ln_gamma.reshape(1, E).astype(jnp.float32)
    be = ln_beta.reshape(1, E).astype(jnp.float32)
    bo = b_out.reshape(1, V).astype(jnp.float32)

    if n_pad != N:
        x2d = jnp.pad(x2d, ((0, n_pad - N), (0, 0)))
    if v_pad != V:
        wo_t = jnp.pad(wo_t, ((0, 0), (0, v_pad - V)))
        bo = jnp.pad(bo, ((0, 0), (0, v_pad - V)))

    grid = (n_pad // tm, v_pad // tv)

    # Optional deeper prefetch of the dominant per-step DMA (the W_out tile),
    # VMEM budget permitting (v5e/v6e at non-max tiles).
    wo_spec_kwargs = {}
    if wo_buffers is not None:
        wo_spec_kwargs = dict(pipeline_mode=pl.Buffered(wo_buffers))

    out = pl.pallas_call(
        _lm_head_kernel,
        out_shape=jax.ShapeDtypeStruct((n_pad, v_pad), out_dtype),
        grid_spec=pltpu.PrefetchScalarGridSpec(
            num_scalar_prefetch=0,
            grid=grid,
            in_specs=[
                pl.BlockSpec((tm, E), lambda i, j: (i, 0)),          # x row tile
                _resident_spec((E, E)),                              # dense weight^T (resident, 1-buf)
                _resident_spec((1, E)),                              # dense bias
                _resident_spec((1, E)),                              # LN gamma
                _resident_spec((1, E)),                              # LN beta
                pl.BlockSpec((E, tv), lambda i, j: (0, j),           # vocab weight^T tile
                             **wo_spec_kwargs),
                pl.BlockSpec((1, tv), lambda i, j: (0, j)),          # vocab bias tile
            ],
            out_specs=pl.BlockSpec((tm, tv), lambda i, j: (i, j)),
            scratch_shapes=[pltpu.VMEM((tm, E), jnp.bfloat16)],
        ),
        compiler_params=pltpu.CompilerParams(
            dimension_semantics=("parallel", "arbitrary"),
            vmem_limit_bytes=vmem_limit_bytes,
        ),
    )(x2d, wd_t, bd, g, be, wo_t, bo)

    return out[:N, :V].reshape(B, T, V)


def _reference(features, w_dense, b_dense, ln_gamma, ln_beta, w_out, b_out):
    x = features.astype(jnp.float32)
    h = jnp.einsum("bte,oe->bto", x, w_dense.astype(jnp.float32)) + b_dense
    h = 0.5 * h * (1.0 + jax.lax.erf(h / jnp.sqrt(2.0)))
    mu = jnp.mean(h, axis=-1, keepdims=True)
    var = jnp.mean((h - mu) ** 2, axis=-1, keepdims=True)
    h = (h - mu) * jax.lax.rsqrt(var + 1e-5)
    h = h * ln_gamma + ln_beta
    return jnp.einsum("bte,ve->btv", h, w_out.astype(jnp.float32)) + b_out


if __name__ == "__main__":
    # Small but tiling-exercising shapes: 2 row tiles, 3 vocab tiles (V padded).
    B, T, E, V = 2, 64, 128, 320

    key = jax.random.PRNGKey(0)
    k1, k2, k3, k4 = jax.random.split(key, 4)

    features = jax.random.normal(k1, (B, T, E), dtype=jnp.float32)
    w_dense = jax.random.normal(k2, (E, E), dtype=jnp.float32) * (1.0 / jnp.sqrt(E))
    b_dense = jax.random.normal(k3, (E,), dtype=jnp.float32) * 0.02
    ln_gamma = jnp.ones((E,), dtype=jnp.float32)
    ln_beta = jnp.zeros((E,), dtype=jnp.float32)
    w_out = jax.random.normal(k4, (V, E), dtype=jnp.float32) * (1.0 / jnp.sqrt(E))
    b_out = jnp.zeros((V,), dtype=jnp.float32)   # matches nn.Parameter(torch.zeros(output_dim))

    ref = _reference(features, w_dense, b_dense, ln_gamma, ln_beta, w_out, b_out)

    # 1) Explicit small tiles (2x3 grid, vocab padding), default bf16 logits.
    logits = roberta_lm_head(features, w_dense, b_dense, ln_gamma, ln_beta,
                             w_out, b_out, tm=64, tv=128)
    logits = jax.block_until_ready(logits)
    assert logits.shape == (B, T, V)
    assert logits.dtype == jnp.bfloat16
    err = float(jnp.max(jnp.abs(logits.astype(jnp.float32) - ref)))
    assert err < 8e-2, err   # bf16 MXU operands + bf16 logits vs f32 reference

    # 2) Auto per-generation tiles (clamped to this tiny problem), f32 logits.
    logits32 = roberta_lm_head(features, w_dense, b_dense, ln_gamma, ln_beta,
                               w_out, b_out, out_dtype=jnp.float32)
    logits32 = jax.block_until_ready(logits32)
    assert logits32.shape == (B, T, V)
    err32 = float(jnp.max(jnp.abs(logits32 - ref)))
    assert err32 < 4e-2, err32

    print("KERNEL_OK")
</pallas_src>

<mosaic_0001>
module attributes {stable_mosaic.version = 11 : i64} {
  func.func @_lm_head_kernel(%arg0: i32, %arg1: i32, %arg2: memref<64x128xbf16, #tpu.memory_space<vmem>>, %arg3: memref<128x128xbf16, #tpu.memory_space<vmem>>, %arg4: memref<1x128xf32, #tpu.memory_space<vmem>>, %arg5: memref<1x128xf32, #tpu.memory_space<vmem>>, %arg6: memref<1x128xf32, #tpu.memory_space<vmem>>, %arg7: memref<128x128xbf16, #tpu.memory_space<vmem>>, %arg8: memref<1x128xf32, #tpu.memory_space<vmem>>, %arg9: memref<64x128xbf16, #tpu.memory_space<vmem>>, %arg10: memref<64x128xbf16, #tpu.memory_space<vmem>>) attributes {dimension_semantics = [#tpu.dimension_semantics<parallel>, #tpu.dimension_semantics<arbitrary>], iteration_bounds = array<i64: 2, 3>, scalar_prefetch = 0 : i64, scratch_operands = 1 : i64, tpu.core_type = #tpu.core_type<tc>, window_params = [{transform_indices = @transform_0, window_bounds = array<i64: 64, 128>}, {pipeline_mode = #tpu.pipeline_mode<synchronous>, transform_indices = @transform_1, window_bounds = array<i64: 128, 128>}, {pipeline_mode = #tpu.pipeline_mode<synchronous>, transform_indices = @transform_2, window_bounds = array<i64: 1, 128>}, {pipeline_mode = #tpu.pipeline_mode<synchronous>, transform_indices = @transform_3, window_bounds = array<i64: 1, 128>}, {pipeline_mode = #tpu.pipeline_mode<synchronous>, transform_indices = @transform_4, window_bounds = array<i64: 1, 128>}, {transform_indices = @transform_5, window_bounds = array<i64: 128, 128>}, {transform_indices = @transform_6, window_bounds = array<i64: 1, 128>}, {transform_indices = @transform_7, window_bounds = array<i64: 64, 128>}]} {
    %c0_i32 = arith.constant 0 : i32
    %0 = arith.cmpi eq, %arg1, %c0_i32 : i32
    %1 = arith.extui %0 : i1 to i32
    %c0_i32_0 = arith.constant 0 : i32
    %2 = arith.cmpi ne, %1, %c0_i32_0 : i32
    scf.if %2 {
      %c0_8 = arith.constant 0 : index
      %c0_9 = arith.constant 0 : index
      %11 = vector.load %arg2[%c0_8, %c0_9] : memref<64x128xbf16, #tpu.memory_space<vmem>>, vector<64x128xbf16>
      %c0_10 = arith.constant 0 : index
      %c0_11 = arith.constant 0 : index
      %12 = vector.load %arg3[%c0_10, %c0_11] : memref<128x128xbf16, #tpu.memory_space<vmem>>, vector<128x128xbf16>
      %cst_12 = arith.constant dense<0.000000e+00> : vector<64x128xf32>
      %13 = tpu.matmul %11, %12, %cst_12 {dimension_numbers = #tpu.dot_dimension_numbers<[1], [0], [0], [1], [0, 0, 1, 1], [], []>} : vector<64x128xbf16>, vector<128x128xbf16>, vector<64x128xf32> -> vector<64x128xf32>
      %c0_13 = arith.constant 0 : index
      %c0_14 = arith.constant 0 : index
      %14 = vector.load %arg4[%c0_13, %c0_14] : memref<1x128xf32, #tpu.memory_space<vmem>>, vector<1x128xf32>
      %15 = vector.broadcast %14 : vector<1x128xf32> to vector<64x128xf32>
      %16 = arith.addf %13, %15 : vector<64x128xf32>
      %cst_15 = arith.constant 5.000000e-01 : f32
      %17 = vector.broadcast %cst_15 : f32 to vector<64x128xf32>
      %18 = arith.mulf %17, %16 : vector<64x128xf32>
      %cst_16 = arith.constant 0.707106769 : f32
      %19 = vector.broadcast %cst_16 : f32 to vector<64x128xf32>
      %20 = arith.mulf %16, %19 : vector<64x128xf32>
      %21 = math.erf %20 : vector<64x128xf32>
      %cst_17 = arith.constant 1.000000e+00 : f32
      %22 = vector.broadcast %cst_17 : f32 to vector<64x128xf32>
      %23 = arith.addf %22, %21 : vector<64x128xf32>
      %24 = arith.mulf %18, %23 : vector<64x128xf32>
      %cst_18 = arith.constant dense<0.000000e+00> : vector<64xf32>
      %25 = vector.multi_reduction <add>, %24, %cst_18 [1] : vector<64x128xf32> to vector<64xf32>
      %26 = vector.shape_cast %25 : vector<64xf32> to vector<64x1xf32>
      %cst_19 = arith.constant 1.280000e+02 : f32
      %27 = vector.broadcast %cst_19 : f32 to vector<64x1xf32>
      %28 = arith.divf %26, %27 : vector<64x1xf32>
      %29 = vector.broadcast %28 : vector<64x1xf32> to vector<64x128xf32>
      %30 = arith.subf %24, %29 : vector<64x128xf32>
      %31 = vector.broadcast %28 : vector<64x1xf32> to vector<64x128xf32>
      %32 = arith.subf %24, %31 : vector<64x128xf32>
      %33 = arith.mulf %30, %32 : vector<64x128xf32>
      %cst_20 = arith.constant dense<0.000000e+00> : vector<64xf32>
      %34 = vector.multi_reduction <add>, %33, %cst_20 [1] : vector<64x128xf32> to vector<64xf32>
      %35 = vector.shape_cast %34 : vector<64xf32> to vector<64x1xf32>
      %cst_21 = arith.constant 1.280000e+02 : f32
      %36 = vector.broadcast %cst_21 : f32 to vector<64x1xf32>
      %37 = arith.divf %35, %36 : vector<64x1xf32>
      %38 = vector.broadcast %28 : vector<64x1xf32> to vector<64x128xf32>
      %39 = arith.subf %24, %38 : vector<64x128xf32>
      %cst_22 = arith.constant 9.99999974E-6 : f32
      %40 = vector.broadcast %cst_22 : f32 to vector<64x1xf32>
      %41 = arith.addf %37, %40 : vector<64x1xf32>
      %42 = math.rsqrt %41 : vector<64x1xf32>
      %43 = vector.broadcast %42 : vector<64x1xf32> to vector<64x128xf32>
      %44 = arith.mulf %39, %43 : vector<64x128xf32>
      %c0_23 = arith.constant 0 : index
      %c0_24 = arith.constant 0 : index
      %45 = vector.load %arg5[%c0_23, %c0_24] : memref<1x128xf32, #tpu.memory_space<vmem>>, vector<1x128xf32>
      %46 = vector.broadcast %45 : vector<1x128xf32> to vector<64x128xf32>
      %47 = arith.mulf %44, %46 : vector<64x128xf32>
      %c0_25 = arith.constant 0 : index
      %c0_26 = arith.constant 0 : index
      %48 = vector.load %arg6[%c0_25, %c0_26] : memref<1x128xf32, #tpu.memory_space<vmem>>, vector<1x128xf32>
      %49 = vector.broadcast %48 : vector<1x128xf32> to vector<64x128xf32>
      %50 = arith.addf %47, %49 : vector<64x128xf32>
      %51 = arith.truncf %50 : vector<64x128xf32> to vector<64x128xbf16>
      %c0_27 = arith.constant 0 : index
      %c0_28 = arith.constant 0 : index
      %52 = vector.load %arg10[%c0_27, %c0_28] : memref<64x128xbf16, #tpu.memory_space<vmem>>, vector<64x128xbf16>
      tpu.vector_store %arg10[%c0_27, %c0_28], %51 {strides = array<i32>} : memref<64x128xbf16, #tpu.memory_space<vmem>>, vector<64x128xbf16>,
    } else {
    }
    %c0 = arith.constant 0 : index
    %c0_1 = arith.constant 0 : index
    %3 = vector.load %arg10[%c0, %c0_1] : memref<64x128xbf16, #tpu.memory_space<vmem>>, vector<64x128xbf16>
    %c0_2 = arith.constant 0 : index
    %c0_3 = arith.constant 0 : index
    %4 = vector.load %arg7[%c0_2, %c0_3] : memref<128x128xbf16, #tpu.memory_space<vmem>>, vector<128x128xbf16>
    %cst = arith.constant dense<0.000000e+00> : vector<64x128xf32>
    %5 = tpu.matmul %3, %4, %cst {dimension_numbers = #tpu.dot_dimension_numbers<[1], [0], [0], [1], [0, 0, 1, 1], [], []>} : vector<64x128xbf16>, vector<128x128xbf16>, vector<64x128xf32> -> vector<64x128xf32>
    %c0_4 = arith.constant 0 : index
    %c0_5 = arith.constant 0 : index
    %6 = vector.load %arg8[%c0_4, %c0_5] : memref<1x128xf32, #tpu.memory_space<vmem>>, vector<1x128xf32>
    %7 = vector.broadcast %6 : vector<1x128xf32> to vector<64x128xf32>
    %8 = arith.addf %5, %7 : vector<64x128xf32>
    %9 = arith.truncf %8 : vector<64x128xf32> to vector<64x128xbf16>
    %c0_6 = arith.constant 0 : index
    %c0_7 = arith.constant 0 : index
    %10 = vector.load %arg9[%c0_6, %c0_7] : memref<64x128xbf16, #tpu.memory_space<vmem>>, vector<64x128xbf16>
    tpu.vector_store %arg9[%c0_6, %c0_7], %9 {strides = array<i32>} : memref<64x128xbf16, #tpu.memory_space<vmem>>, vector<64x128xbf16>,
    return
  }
  func.func @transform_0(%arg0: i32, %arg1: i32) -> (i32, i32) {
    %c0_i32 = arith.constant 0 : i32
    %c0_i32_0 = arith.constant 0 : i32
    return %arg0, %c0_i32 : i32, i32
  }
  func.func @transform_1(%arg0: i32, %arg1: i32) -> (i32, i32) {
    %c0_i32 = arith.constant 0 : i32
    %c0_i32_0 = arith.constant 0 : i32
    %c0_i32_1 = arith.constant 0 : i32
    return %c0_i32, %c0_i32_0 : i32, i32
  }
  func.func @transform_2(%arg0: i32, %arg1: i32) -> (i32, i32) {
    %c0_i32 = arith.constant 0 : i32
    %c0_i32_0 = arith.constant 0 : i32
    %c0_i32_1 = arith.constant 0 : i32
    return %c0_i32, %c0_i32_0 : i32, i32
  }
  func.func @transform_3(%arg0: i32, %arg1: i32) -> (i32, i32) {
    %c0_i32 = arith.constant 0 : i32
    %c0_i32_0 = arith.constant 0 : i32
    %c0_i32_1 = arith.constant 0 : i32
    return %c0_i32, %c0_i32_0 : i32, i32
  }
  func.func @transform_4(%arg0: i32, %arg1: i32) -> (i32, i32) {
    %c0_i32 = arith.constant 0 : i32
    %c0_i32_0 = arith.constant 0 : i32
    %c0_i32_1 = arith.constant 0 : i32
    return %c0_i32, %c0_i32_0 : i32, i32
  }
  func.func @transform_5(%arg0: i32, %arg1: i32) -> (i32, i32) {
    %c0_i32 = arith.constant 0 : i32
    %c0_i32_0 = arith.constant 0 : i32
    return %c0_i32, %arg1 : i32, i32
  }
  func.func @transform_6(%arg0: i32, %arg1: i32) -> (i32, i32) {
    %c0_i32 = arith.constant 0 : i32
    %c0_i32_0 = arith.constant 0 : i32
    return %c0_i32, %arg1 : i32, i32
  }
  func.func @transform_7(%arg0: i32, %arg1: i32) -> (i32, i32) {
    %c0_i32 = arith.constant 0 : i32
    return %arg0, %arg1 : i32, i32
  }
}

</mosaic_0001>

<bundles_post_ra>
// kernel: tpu_custom_call.1
= control target key start
LH: loop header
LB: loop body
LE: loop exit
PB: predicated region body
PF: predicated region fallthrough
CT: control target
= control target key end

     0   :  { %s2197_s0 = inlined_call_operand.hbm [shape: bf16[128,128], index: 0, kind: input, shape index: {}]   ;;  %s2198_s1 = inlined_call_operand.hbm [shape: bf16[128,128], index: 1, kind: input, shape index: {}]   ;;  %s2199_s2 = inlined_call_operand.vmem [shape: f32[1,128], index: 2, kind: input, shape index: {}]   ;;  %s2200_s3 = inlined_call_operand.vmem [shape: f32[1,128], index: 3, kind: input, shape index: {}]   ;;  %s2201_s4 = inlined_call_operand.vmem [shape: f32[1,128], index: 4, kind: input, shape index: {}]   ;;  %s2202_s5 = inlined_call_operand.hbm [shape: bf16[128,384], index: 5, kind: input, shape index: {}]   ;;  %s2203_s6 = inlined_call_operand.vmem [shape: f32[1,384], index: 6, kind: input, shape index: {}]   ;;  %s2204_s7 = inlined_call_operand.hbm [shape: bf16[128,384], index: 7, kind: output, shape index: {}]  }
   0x1   :  { %2225 = sst [smem:[#allocation25_spill]] %s2197_s0 }
   0x2   :  { %2226 = sst [smem:[#allocation26_spill]] %s2199_s2 }
   0x3   :  { %2227 = sst [smem:[#allocation27_spill]] %s2200_s3 }
   0x4   :  { %2228 = sst [smem:[#allocation28_spill]] %s2201_s4 }
   0x5   :  { %2229 = sst [smem:[#allocation29_spill]] %s2203_s6 }
   0x6   :  { %2230 = sst [smem:[#allocation30_spill]] %s2204_s7 }
   0x7   :  { %12 = vsyncpa [#allocation4], 0 }
   0x8   :  { %14 = vsyncpa [#allocation4 + $0x1], 0 }
   0x9   :  { %15 = vsyncpa [#allocation7], 0 }
   0xa   :  { %16 = vsyncpa [#allocation5], 0 }
   0xb   :  { %18 = vsyncpa [#allocation5 + $0x1], 0  ;;  %s1724_s24 = smov 0   ;;  %s1726_s25 = smov 0  }
   0xc   :  { %s1728_s26 = smov 0   ;;  %s1730_s27 = smov 0  }
   0xd   :  { %s1732_s28 = smov 0   ;;  %s1734_s29 = smov 0  }
   0xe   :  { %s1736_s30 = smov 0   ;;  %s1738_s8 = smov 0  }
   0xf   :  { %s1740_s9 = smov 0   ;;  %s1742_s10 = smov 0  }
  0x10   :  { %s1744_s11 = smov 0   ;;  %s1746_s12 = smov 0  }
  0x11   :  { %s1748_s13 = smov 0   ;;  %s1750_s14 = smov 0  }
  0x12 LB: > { %2231 = sst [smem:[#allocation14_spill]] %s1640_s29  ;;  %s33_s15 = sadd.s32 1, %s1664_s12  ;;  %s1672_s14 = sphi %s1750_s14, %s24_s14   ;;  %s1668_s13 = sphi %s1748_s13, %s2292_s13   ;;  %s1664_s12 = sphi %s1746_s12, %s2283_s12   ;;  %s1660_s11 = sphi %s1744_s11, %s2282_s11   ;;  %s1656_s10 = sphi %s1742_s10, %s2281_s10   ;;  %s1652_s9 = sphi %s1740_s9, %s2280_s9   ;;  %s1648_s8 = sphi %s1738_s8, %s2291_s8   ;;  %s1644_s30 = sphi %s1736_s30, %s2290_s30   ;;  %s1640_s29 = sphi %s1734_s29, %s2278_s29   ;;  %s1636_s28 = sphi %s1732_s28, %s2289_s28   ;;  %s1632_s27 = sphi %s1730_s27, %s2288_s27   ;;  %s1628_s26 = sphi %s1728_s26, %s2287_s26   ;;  %s1624_s25 = sphi %s1726_s25, %s2286_s25   ;;  %s1620_s24 = sphi %s1724_s24, %s2285_s24  }
  0x13   : > { %2232 = sst [smem:[#allocation15_spill]] %s1652_s9  ;;  %s36_s16 = sadd.s32 1, %s1668_s13 }
  0x14   : > { %2233 = sst [smem:[#allocation16_spill]] %s1656_s10  ;;  %p34_p0 = scmp.ge.s32.totalorder %s33_s15, 3 }
  0x15   : > { %2234 = sst [smem:[#allocation17_spill]] %s1660_s11  ;;  %s43_s17 = sadd.s32 1, %s1652_s9 }
  0x16   : > { %2235 = sst [smem:[#allocation18_spill]] %s1664_s12  ;;  %p50_p1 = scmp.ne.s32.totalorder %s1652_s9, %s1648_s8 }
  0x17   : > { %2236 = sst [smem:[#allocation19_spill]] %s1668_s13  ;;  %p2210_p2 = scmp.eq.s32.totalorder %s1672_s14, 0 }
  0x18   : > { %s2294_s15 = smov (%p34_p0, %s33_s15), 0  ;;  %s2296_s16 = smov (!%p34_p0, %s36_s16), %s1668_s13 }
  0x19   : > { %2237 = sst [smem:[#allocation20_spill]] %s2294_s15  ;;  %p1805_p3 = por %p2210_p2, %p50_p1 }
  0x1a   : > { %s1811_s19 = ssub.s32 %s1664_s12, %s2294_s15  ;;  %p38_p4 = scmp.ge.s32.totalorder %s2296_s16, 2 }
  0x1b   : > { %p151_p5 = scmp.eq.s32.totalorder %s1811_s19, 0  ;;  %s207_s20 = sadd.s32 1, %s1628_s26 }
  0x1c   : > { %s2298_s16 = smov (%p38_p4, %s2296_s16), 0  ;;  %p2209_p6 = scmp.lt.s32.totalorder %s1672_s14, 6 }
  0x1d   : > { %2239 = sst [smem:[#allocation21_spill]] %s2298_s16  ;;  %s40_s21 = ssub.s32 %s1668_s13, %s2298_s16 }
  0x1e   : > { %p41_p7 = scmp.eq.s32.totalorder %s40_s21, 0  ;;  %s204_s22 = sor.u32 %s1811_s19, %s40_s21 }
  0x1f   : > { %p205_p8 = scmp.eq.s32.totalorder %s204_s22, 0  ;;  %s266_s23 = sand.u32 1, %s1672_s14  }
  0x20   : > { %s1823_s7 = scalar_select %p41_p7, %s1652_s9, %s43_s17  }
  0x21   : > { %s1826_s15 = scalar_select %p205_p8, %s1628_s26, %s207_s20  }
  0x22   : > { %2240 = sst [smem:[#allocation22_spill]] %s1823_s7  ;;  %s268_s11 = sand.u32 1, %s1652_s9  }
  0x23   : > { %2241 = sst [smem:[#allocation23_spill]] %s1826_s15  ;;  %s1044_s4 = sshll.u32 %s268_s11, 5 }
  0x24   : > { %s1093_s3 = sshll.u32 %s1668_s13, 9  ;;  %s2242_s0 = sld [smem:[#allocation25_spill]] }
  0x25   : > { %s270_s16 = scalar_lea.vmem [#allocation3], %s1044_s4  ;;  %p1839_p9 = pnand %p2209_p6, %p1805_p3 }
  0x26   : > { %s277_s21 = sshll.u32 %s270_s16, 4  ;;  %s1845_s11 = scalar_lea.sflag [#allocation4], %s266_s23  ;;  %s1843_s21 = int_to_ptr.vmem [resolvable:$true] %s277_s21 }
  0x27   : > { %p1432_p11 = pneg %p1839_p9 }
  0x2a   : > { %s1833_s10 = scalar_lea.hbm %s2242_s0, %s1093_s3  ;;  %s1435_s6 = scalar_lea.hbm %s2242_s0, 1024 }
  0x2b   : > { %s1430_s2 = scalar_lea.hbm %s1833_s10, 512  ;;  %p1436_p0 = scmp.lt.u32.totalorder %s1833_s10, %s2242_s0 }
  0x2c   : > { %p1431_p10 = scmp.ne.s32.totalorder %s1833_s10, %s1430_s2  ;;  %p1437_p1 = scmp.lt.u32.totalorder %s1435_s6, %s1430_s2 }
  0x2d   : > { %p1439_p4 = scmp.lt.u32.totalorder %s1430_s2, %s1833_s10 }
  0x2e   : > { %p1433_p12 = pnand %p1432_p11, %p1431_p10  ;;  %p1438_p3 = por %p1437_p1, %p1436_p0 }
  0x30   : > { %p1434_p13 = pneg %p1433_p12  ;;  %p1440_p7 = por %p1439_p4, %p1438_p3 }
  0x32   : > { %p1441_p8 = pnand %p1440_p7, %p1434_p13 }
  0x34   : > { %1444 = shalt.err (!%p1441_p8)
}
  0x35   : > { %s1445_s20 = scalar_lea.vmem %s1843_s21, 512  ;;  %s1674_s22 = smov [#allocation3]  }
  0x36   : > { %p1446_p10 = scmp.ne.s32.totalorder %s1843_s21, %s1445_s20  ;;  %s1450_s23 = sshll.u32 %s1674_s22, 4  ;;  %s1451_s23 = int_to_ptr.vmem [resolvable:$false] %s1450_s23 }
  0x37   : > { %s1452_s3 = scalar_lea.vmem %s1451_s23, 1024  ;;  %p1453_p2 = scmp.lt.s32.totalorder %s1843_s21, %s1451_s23 }
  0x38   : > { %p1448_p12 = pnand %p1446_p10, %p1432_p11  ;;  %p1454_p0 = scmp.lt.s32.totalorder %s1452_s3, %s1445_s20 }
  0x3a   : > { %p1449_p6 = pneg %p1448_p12  ;;  %p1455_p1 = por %p1454_p0, %p1453_p2 }
  0x3c   : > { %p1456_p3 = pnand %p1455_p1, %p1449_p6 }
  0x3e   : > { %1459 = shalt.err (!%p1456_p3)
}
  0x3f   : > { %s2211_s2 = smov 64   ;;  %s2213_s4 = smov 4  }
  0x40   : > { %1247 = dma.hbm_to_vmem [thread:$0]  (!%p1839_p9), %s1833_s10, 512, %s1843_s21, %s1845_s11, %s2211_s2, %s2211_s2, %s2213_s4  }
  0x41   : > { %s1877_s6 = sadd.s32 4294967295, %s1672_s14   ;;  %s1040_s16 = sadd.s32 4294967294, %s1672_s14  }
  0x42   : > { %p56_p2 = scmp.ne.s32.totalorder %s1648_s8, %s1644_s30  ;;  %p2219_p6 = scmp.eq.s32.totalorder %s1877_s6, 0 }
  0x43   : > { %s153_s18 = sadd.s32 1, %s1640_s29  ;;  %p160_p11 = scmp.ne.s32.totalorder %s1640_s29, %s1636_s28 }
  0x44   : > { %p1888_p13 = por %p2219_p6, %p56_p2  ;;  %p166_p4 = scmp.ne.s32.totalorder %s1636_s28, %s1632_s27 }
  0x45   : > { %s1897_s10 = scalar_select %p151_p5, %s1640_s29, %s153_s18  }
  0x46   : > { %s2244_s17 = scalar_select %p1888_p13, 1, 0 }
  0x47   : > { %2245 = sst [smem:[#allocation24_spill]] %s1897_s10  ;;  %p2246_p9 = scmp.eq.s32.totalorder %s1672_s14, 0 }
  0x48   : > { %p1907_p8 = por %p166_p4, %p2219_p6  ;;  %p217_p10 = scmp.ne.s32.totalorder %s1628_s26, %s1624_s25 }
  0x49   : > { %p1901_p7 = por %p160_p11, %p2246_p9  ;;  %p218_p12 = scmp.eq.s32.totalorder %s1877_s6, 5 }
  0x4a   : > { %s2248_s30 = scalar_select %p1907_p8, 1, 0 }
  0x4b   : > { %p223_p0 = scmp.ne.s32.totalorder %s1624_s25, %s1620_s24  ;;  %p224_p1 = scmp.eq.s32.totalorder %s1040_s16, 5 }
  0x4c   : > { %p1916_p5 = por %p218_p12, %p217_p10  ;;  %p1041_p3 = scmp.ge.s32.totalorder %s1672_s14, 1 }
  0x4d   : > { %p1921_p2 = por %p224_p1, %p223_p0  ;;  %p231_p11 = scmp.lt.s32.totalorder %s1672_s14, 7 }
  0x4e   : > { %s2249_s27 = scalar_select %p1916_p5, 1, 0 }
  0x4f   : > { %s2250_s19 = scalar_select %p1921_p2, 1, 0 }
  0x50   : > { %p1926_p4 = pnand %p1041_p3, %p231_p11  ;;  %s1677_s22 = smov [#allocation6]  }
  0x51   : > { %s243_s23 = sshll.u32 %s1677_s22, 4  ;;  %p2252_p9 = scmp.lt.s32.totalorder %s1672_s14, 6  ;;  %s1930_s23 = int_to_ptr.vmem [resolvable:$true] %s243_s23 }
  0x52   : > { %s2251_s20 = scalar_select %p1926_p4, 1, 0 }
  0x53   : > { %p1936_p10 = pnand %p2252_p9, %p1901_p7  ;;  %p1240_p12 = pneg %p1926_p4 }
  0x54   : > { %s289_s16 = sand.u32 1, %s1640_s29   ;;  %s1048_s4 = sshll.u32 %s1664_s12, 6 }
  0x55   : > { %s2253_s3 = scalar_select %p1936_p10, 1, 0 }
  0x56   : > { %s1047_s18 = sshll.u32 %s289_s16, 6  ;;  %p1945_p0 = pnand %p1240_p12, %p2219_p6 }
  0x57   : > { %s291_s22 = scalar_lea.vmem [#allocation8], %s1047_s18  ;;  %s1953_s7 = scalar_lea.hbm %s2202_s5, %s1048_s4 }
  0x58   : > { %s297_s0 = sshll.u32 %s291_s22, 4  ;;  %s1460_s15 = scalar_lea.hbm %s2198_s1, 1024  ;;  %s1979_s0 = int_to_ptr.vmem [resolvable:$true] %s297_s0 }
  0x59   : > { %p1461_p7 = scmp.ne.s32.totalorder %s2198_s1, %s1460_s15  ;;  %p1462_p1 = pneg %p1945_p0 }
  0x5a   : > { %p1467_p9 = scmp.lt.u32.totalorder %s1460_s15, %s2198_s1 }
  0x5b   : > { %p1463_p3 = pnand %p1462_p1, %p1461_p7 }
  0x5d   : > { %p1464_p11 = pneg %p1463_p3 }
  0x5f   : > { %p1469_p12 = pnand %p1467_p9, %p1464_p11 }
  0x61   : > { %1472 = shalt.err (!%p1469_p12)
}
  0x62   : > { %s1473_s13 = scalar_lea.vmem %s1930_s23, 1024  ;;  %p1481_p8 = scmp.lt.s32.totalorder %s1930_s23, %s1930_s23 }
  0x63   : > { %p1474_p6 = scmp.ne.s32.totalorder %s1930_s23, %s1473_s13  ;;  %p1482_p13 = scmp.lt.s32.totalorder %s1473_s13, %s1473_s13 }
  0x65   : > { %p1476_p2 = pnand %p1474_p6, %p1462_p1  ;;  %p1483_p4 = por %p1482_p13, %p1481_p8 }
  0x67   : > { %p1477_p5 = pneg %p1476_p2 }
  0x69   : > { %p1484_p10 = pnand %p1483_p4, %p1477_p5 }
  0x6b   : > { %1487 = shalt.err (!%p1484_p10)
}
  0x6c   : > { %s2255_s29 = smov 4   ;;  %s2256_s9 = smov 64  }
  0x6d   : > { %1243 = dma.hbm_to_vmem [thread:$0]  (!%p1945_p0), %s2198_s1, 1024, %s1930_s23, [#allocation7], %s2256_s9, %s2256_s9, %s2255_s29  }
  0x6e   : > { %s1488_s4 = scalar_lea.hbm %s1953_s7, 1024  ;;  %p2257_p13 = scmp.ne.s32.totalorder %s2253_s3, 0 }
  0x6f   : > { %p1489_p6 = scmp.ne.s32.totalorder %s1953_s7, %s1488_s4  ;;  %s1493_s22 = scalar_lea.hbm %s2202_s5, 3072 }
  0x70   : > { %p1490_p8 = pneg %p2257_p13  ;;  %p1494_p4 = scmp.lt.u32.totalorder %s1953_s7, %s2202_s5 }
  0x71   : > { %p1495_p10 = scmp.lt.u32.totalorder %s1493_s22, %s1488_s4  ;;  %p1497_p7 = scmp.lt.u32.totalorder %s1488_s4, %s1953_s7 }
  0x72   : > { %p1491_p5 = pnand %p1490_p8, %p1489_p6 }
  0x73   : > { %p1496_p0 = por %p1495_p10, %p1494_p4 }
  0x74   : > { %p1492_p2 = pneg %p1491_p5 }
  0x75   : > { %p1498_p1 = por %p1497_p7, %p1496_p0 }
  0x77   : > { %p1499_p3 = pnand %p1498_p1, %p1492_p2 }
  0x79   : > { %1502 = shalt.err (!%p1499_p3)
}
  0x7a   : > { %s1503_s23 = scalar_lea.vmem %s1979_s0, 1024  ;;  %s1678_s18 = smov [#allocation8]  }
  0x7b   : > { %p1504_p11 = scmp.ne.s32.totalorder %s1979_s0, %s1503_s23  ;;  %s1508_s13 = sshll.u32 %s1678_s18, 4  ;;  %s1509_s13 = int_to_ptr.vmem [resolvable:$false] %s1508_s13 }
  0x7c   : > { %s1510_s12 = scalar_lea.vmem %s1509_s13, 2048  ;;  %p1511_p6 = scmp.lt.s32.totalorder %s1979_s0, %s1509_s13 }
  0x7d   : > { %p1506_p9 = pnand %p1504_p11, %p1490_p8  ;;  %p1512_p5 = scmp.lt.s32.totalorder %s1510_s12, %s1503_s23 }
  0x7f   : > { %p1507_p12 = pneg %p1506_p9  ;;  %p1513_p4 = por %p1512_p5, %p1511_p6 }
  0x81   : > { %p1514_p10 = pnand %p1513_p4, %p1507_p12 }
  0x83   : > { %1517 = shalt.err (!%p1514_p10)
}
  0x84   : > { %s1679_s15 = smov 192   ;;  %p2258_p8 = scmp.ne.s32.totalorder %s2251_s20, 0 }
  0x85   : > { %1250 = dma.hbm_to_vmem [thread:$0]  (!%p2257_p13), %s1953_s7, 1024, %s1979_s0, %s1845_s11, %s1679_s15, %s2256_s9, %s2255_s29  }
  0x86   : > { %315 = sbr.rel (%p2258_p8) target bundleno = 1020 (0x3fc), region = 48  ;;  %s317_s4 = sand.u32 (!%p2258_p8), 1, %s1877_s6  }
  0x87   : > { %s319_s2 = sand.u32 (!%p2258_p8), 1, %s1648_s8   ;;  %s318_s22 = scalar_lea.sflag (!%p2258_p8), [#allocation4], %s317_s4 }
  0x88   : > { %s1050_s10 = sshll.u32 (!%p2258_p8), %s319_s2, 5  ;;  %p2259_p2 = scmp.ne.s32.totalorder (!%p2258_p8), %s2244_s17, 0 }
  0x89   : > { %s2013_s21 = scalar_lea.vmem (!%p2258_p8), [#allocation3], %s1050_s10 }
  0x8d   : > { %1603 = dma.done.wait (%p2259_p2), %s318_s22, 512  }
  0x8e   : > { %1605 = vsyncadd (%p2259_p2), %s318_s22, 4294966784  ;;  %p2260_p0 = scmp.eq.s32.totalorder %s1877_s6, 0 }
  0x90   : > { %1607 = dma.done.wait (%p2260_p0), [#allocation7], 1024   ;;  %p2261_p13 = pmov %p2260_p0 }
  0x91   : > { %s332_s0 = sand.u32 1, %s1636_s28   ;;  %p2262_p7 = scmp.ne.s32.totalorder %s2248_s30, 0 }
  0x92   : > { %1609 = vsyncadd (%p2261_p13), [#allocation7], 4294966272  ;;  %s1052_s7 = sshll.u32 %s332_s0, 6 }
  0x93   : > { %s2024_s11 = scalar_lea.vmem [#allocation8], %s1052_s7 }
  0x94   : > { %1611 = dma.done.wait (%p2262_p7), %s318_s22, 1024  }
  0x95   : > { %1613 = vsyncadd (%p2262_p7), %s318_s22, 4294966272  ;;  %s2263_s17 = sld [smem:[#allocation16_spill]]  ;;  %s370_s20 = sand.u32 1, %s1624_s25  }
  0x96   : > { %s1053_s6 = sshll.u32 %s370_s20, 5  ;;  %s2264_s16 = sld [smem:[#allocation29_spill]] }
  0x97   : > { %s2041_s18 = scalar_lea.vmem [#allocation9], %s1053_s6 }
  0x9b   : > { %p374_p1 = scmp.lt.s32.totalorder %s2263_s17, 2  ;;  %p1054_p3 = scmp.ne.s32.totalorder %s2263_s17, 0 }
  0x9c   : > { %v1378_v0 = vld [vmem:[#allocation6] sm:$0xff] (!%p1054_p3)   ;;  %v1379_v1 = vld [vmem:[#allocation6 + $0x8] sm:$0xff] (!%p1054_p3)   ;;  %v1380_v2 = vld [vmem:[#allocation6 + $0x10] sm:$0xff] (!%p1054_p3)   ;;  %s2265_s12 = sld [smem:[#allocation26_spill]] (!%p1054_p3)  ;;  %s2266_s2 = sld [smem:[#allocation27_spill]] (!%p1054_p3) }
  0x9d   : > { %s2035_s3 = scalar_select %p374_p1, %s2263_s17, 2 }
  0x9e   : > { %382 = sbr.rel (%p1054_p3) target bundleno = 752 (0x2f0), region = 64  ;;  %1149 = vmatprep.subr.bf16.mxu0 (!%p1054_p3), %v1378_v0  ;;  %1197 = vmatprep.subr.bf16.mxu1 (!%p1054_p3), %v1378_v0  ;;  %v1381_v3 = vld [vmem:[#allocation6 + $0x18] sm:$0xff] (!%p1054_p3)   ;;  %v1386_v4 = vld [vmem:[%s2013_s21] sm:$0xff] (!%p1054_p3)   ;;  %v1387_v5 = vld [vmem:[%s2013_s21 + $0x10] sm:$0xff] (!%p1054_p3)  }
  0x9f   : > { %s376_s23 = scalar_lea.vmem %s2264_s16, %s2035_s3  ;;  %1150 = vmatpush3.bf16.msra.mxu0 (!%p1054_p3), %v1378_v0  ;;  %1205 = vmatpush3.bf16.msra.mxu1 (!%p1054_p3), %v1378_v0  ;;  %v1382_v6 = vld [vmem:[#allocation6 + $0x20] sm:$0xff] (!%p1054_p3)   ;;  %v1383_v7 = vld [vmem:[#allocation6 + $0x28] sm:$0xff] (!%p1054_p3)   ;;  %v1384_v8 = vld [vmem:[#allocation6 + $0x30] sm:$0xff] (!%p1054_p3)  }
  0xa0   : > { %1151 = vmatprep.subr.bf16.mxu0 (!%p1054_p3), %v1379_v1  ;;  %1198 = vmatprep.subr.bf16.mxu1 (!%p1054_p3), %v1379_v1  ;;  %v1385_v9 = vld [vmem:[#allocation6 + $0x38] sm:$0xff] (!%p1054_p3)   ;;  %v1388_v10 = vld [vmem:[%s2013_s21 + $0x8] sm:$0xff] (!%p1054_p3)  }
  0xa1   : > { %1165 = vmatprep.mubr.bf16.mxu0 (!%p1054_p3), %v1386_v4  ;;  %1169 = vmatprep.mubr.bf16.mxu1 (!%p1054_p3), %v1387_v5  ;;  %v1389_v11 = vld [vmem:[%s2013_s21 + $0x18] sm:$0xff] (!%p1054_p3)   ;;  %s2267_s21 = sld [smem:[#allocation28_spill]] (!%p1054_p3) }
  0xa2   : > { %v1055_v12 = vld [vmem:[%s2265_s12] ss:$0 sm:$0xff] (!%p1054_p3) }
  0xa3   : > { %1152 = vmatpush3.bf16.msra.mxu0 (!%p1054_p3), %v1379_v1  ;;  %1206 = vmatpush3.bf16.msra.mxu1 (!%p1054_p3), %v1379_v1 }
  0xa4   : > { %1153 = vmatprep.subr.bf16.mxu0 (!%p1054_p3), %v1380_v2  ;;  %1199 = vmatprep.subr.bf16.mxu1 (!%p1054_p3), %v1380_v2 }
  0xa7   : > { %1154 = vmatpush3.bf16.msra.mxu0 %v1380_v2  ;;  %1207 = vmatpush3.bf16.msra.mxu1 %v1380_v2 }
  0xa8   : > { %1155 = vmatprep.subr.bf16.mxu0 %v1381_v3  ;;  %1200 = vmatprep.subr.bf16.mxu1 %v1381_v3 }
  0xab   : > { %1156 = vmatpush3.bf16.msra.mxu0 %v1381_v3  ;;  %1208 = vmatpush3.bf16.msra.mxu1 %v1381_v3 }
  0xac   : > { %1157 = vmatprep.subr.bf16.mxu0 %v1382_v6  ;;  %1201 = vmatprep.subr.bf16.mxu1 %v1382_v6 }
  0xaf   : > { %1158 = vmatpush3.bf16.msra.mxu0 %v1382_v6  ;;  %1209 = vmatpush3.bf16.msra.mxu1 %v1382_v6 }
  0xb0   : > { %1159 = vmatprep.subr.bf16.mxu0 %v1383_v7  ;;  %1202 = vmatprep.subr.bf16.mxu1 %v1383_v7 }
  0xb3   : > { %1160 = vmatpush3.bf16.msra.mxu0 %v1383_v7  ;;  %1210 = vmatpush3.bf16.msra.mxu1 %v1383_v7 }
  0xb4   : > { %1161 = vmatprep.subr.bf16.mxu0 %v1384_v8  ;;  %1203 = vmatprep.subr.bf16.mxu1 %v1384_v8 }
  0xb7   : > { %1162 = vmatpush3.bf16.msra.mxu0 %v1384_v8  ;;  %1211 = vmatpush3.bf16.msra.mxu1 %v1384_v8 }
  0xb8   : > { %1163 = vmatprep.subr.bf16.mxu0 %v1385_v9  ;;  %1204 = vmatprep.subr.bf16.mxu1 %v1385_v9 }
  0xbb   : > { %1164 = vmatpush3.bf16.msra.mxu0 %v1385_v9  ;;  %1212 = vmatpush3.bf16.msra.mxu1 %v1385_v9 }
  0xbe   : > { %1166 = vmatmul.mubr.bf16.vlgmr.msra.gmra.mrb[0].mxu0 %v1388_v10  ;;  %1170 = vmatmul.mubr.bf16.vlgmr.msra.gmra.mrb[0].mxu1 %v1389_v11 }
 0x191   : > { %v1167_v13 = vpop.f32.mrb[0].mxu0  ;;  %v1171_v14 = vpop.f32.mrb[0].mxu1 }
 0x192   : > { %v529_v15 = vadd.f32 %v1167_v13, %v1055_v12  ;;  %v520_v16 = vpop.f32.mrb[1].mxu0  ;;  %v536_v17 = vpop.f32.mrb[1].mxu1  ;;  %v545_v31 = vadd.f32 %v1171_v14, %v1055_v12 }
 0x193   : > { %v521_v18 = vadd.f32 %v1055_v12, %v520_v16  ;;  %v537_v19 = vadd.f32 %v1055_v12, %v536_v17  ;;  %v1168_v20 = vpop.f32.mrb[2].mxu0  ;;  %v1172_v21 = vpop.f32.mrb[2].mxu1 }
 0x194   : > { %v561_v22 = vmul.f32 0.70710677, %v529_v15  ;;  %v532_v25 = vadd.f32 %v1168_v20, %v1055_v12  ;;  %v548_v26 = vadd.f32 %v1172_v21, %v1055_v12  ;;  %v523_v27 = vpop.f32.mrb[3].mxu0  ;;  %v539_v28 = vpop.f32.mrb[3].mxu1  ;;  %v565_v36 = vmul.f32 0.70710677, %v545_v31 }
 0x195   : > { %v559_v23 = vmul.f32 0.70710677, %v521_v18  ;;  %v563_v24 = vmul.f32 0.70710677, %v537_v19  ;;  %v524_v29 = vadd.f32 %v1055_v12, %v523_v27  ;;  %v540_v30 = vadd.f32 %v1055_v12, %v539_v28 }
 0x196   : > { %1390 = verf.f32 %v561_v22  ;;  %v562_v32 = vmul.f32 0.70710677, %v532_v25  ;;  %v566_v34 = vmul.f32 0.70710677, %v548_v26  ;;  %v553_v38 = vmul.f32 0.5, %v529_v15 }
 0x197   : > { %1392 = verf.f32 %v559_v23  ;;  %v560_v33 = vmul.f32 0.70710677, %v524_v29  ;;  %v564_v35 = vmul.f32 0.70710677, %v540_v30  ;;  %v551_v42 = vmul.f32 0.5, %v521_v18 }
 0x198   : > { %1394 = verf.f32 %v563_v24  ;;  %v554_v46 = vmul.f32 0.5, %v532_v25  ;;  %v555_v52 = vmul.f32 0.5, %v537_v19  ;;  %v556_v56 = vmul.f32 0.5, %v540_v30 }
 0x199   : > { %1396 = verf.f32 %v562_v32  ;;  %v552_v60 = vmul.f32 0.5, %v524_v29  ;;  %v558_v63 = vmul.f32 0.5, %v548_v26  ;;  %v557_v2 = vmul.f32 0.5, %v545_v31 }
 0x19a   : > { %1398 = verf.f32 %v560_v33 }
 0x19b   : > { %1400 = verf.f32 %v564_v35 }
 0x19c   : > { %1402 = verf.f32 %v566_v34 }
 0x19d   : > { %1404 = verf.f32 %v565_v36 }
 0x1a0   : > { %v1391_v37 = vpop.eup %1390 }
 0x1a1   : > { %v577_v39 = vadd.f32 1.0, %v1391_v37  ;;  %v1393_v40 = vpop.eup %1392 }
 0x1a2   : > { %v1395_v41 = vpop.eup %1394  ;;  %v575_v44 = vadd.f32 1.0, %v1393_v40 }
 0x1a3   : > { %v585_v43 = vmul.f32 %v577_v39, %v553_v38  ;;  %v1397_v45 = vpop.eup %1396  ;;  %v579_v49 = vadd.f32 1.0, %v1395_v41 }
 0x1a4   : > { %v583_v47 = vmul.f32 %v575_v44, %v551_v42  ;;  %v578_v48 = vadd.f32 1.0, %v1397_v45  ;;  %v1399_v50 = vpop.eup %1398 }
 0x1a5   : > { %595 = vadd.xlane.f32.xlu1 %v585_v43  ;;  %v1401_v51 = vpop.eup %1400  ;;  %v587_v57 = vmul.f32 %v579_v49, %v555_v52  ;;  %v576_v58 = vadd.f32 1.0, %v1399_v50 }
 0x1a6   : > { %591 = vadd.xlane.f32.xlu0 %v583_v47  ;;  %v586_v53 = vmul.f32 %v578_v48, %v554_v46  ;;  %v1403_v54 = vpop.eup %1402  ;;  %v580_v55 = vadd.f32 1.0, %v1401_v51 }
 0x1a7   : > { %v1405_v59 = vpop.eup %1404  ;;  %v582_v62 = vadd.f32 1.0, %v1403_v54  ;;  %v584_v0 = vmul.f32 %v576_v58, %v552_v60  ;;  %v1068_v58 = vld [vmem:[%s2266_s2] ss:$0 sm:$0xff] }
 0x1a8   : > { %v588_v61 = vmul.f32 %v580_v55, %v556_v56  ;;  %v581_v1 = vadd.f32 1.0, %v1405_v59 }
 0x1a9   : > { %597 = vadd.xlane.f32.xlu1 %v586_v53  ;;  %v590_v3 = vmul.f32 %v582_v62, %v558_v63 }
 0x1aa   : > { %599 = vadd.xlane.f32.xlu0 %v587_v57  ;;  %v589_v4 = vmul.f32 %v581_v1, %v557_v2 }
 0x1ad   : > { %601 = vadd.xlane.f32.xlu1 %v588_v61 }
 0x1ae   : > { %593 = vadd.xlane.f32.xlu0 %v584_v0 }
 0x1b1   : > { %605 = vadd.xlane.f32.xlu1 %v590_v3 }
 0x1b2   : > { %603 = vadd.xlane.f32.xlu0 %v589_v4 }
 0x232   : > { %v596_v5 = vpop.xlane.xlu1 %595 }
 0x233   : > { %v610_v6 = vmul.f32 0.0078125, %v596_v5  ;;  %v592_v7 = vpop.xlane.xlu0 %591 }
 0x234   : > { %v608_v9 = vmul.f32 0.0078125, %v592_v7 }
 0x235   : > { %v618_v8 = vsub.f32 %v585_v43, %v610_v6 }
 0x236   : > { %v598_v10 = vpop.xlane.xlu1 %597  ;;  %v2051_v11 = vsub.f32 %v583_v47, %v608_v9 }
 0x237   : > { %v611_v12 = vmul.f32 0.0078125, %v598_v10  ;;  %v626_v13 = vmul.f32 %v618_v8, %v618_v8  ;;  %v600_v14 = vpop.xlane.xlu0 %599 }
 0x238   : > { %v612_v16 = vmul.f32 0.0078125, %v600_v14  ;;  %v624_v20 = vmul.f32 %v2051_v11, %v2051_v11 }
 0x239   : > { %v2053_v15 = vsub.f32 %v586_v53, %v611_v12  ;;  %636 = vadd.xlane.f32.xlu0 %v626_v13 }
 0x23a   : > { %v602_v17 = vpop.xlane.xlu1 %601  ;;  %v2055_v18 = vsub.f32 %v587_v57, %v612_v16 }
 0x23b   : > { %v627_v19 = vmul.f32 %v2053_v15, %v2053_v15  ;;  %v594_v21 = vpop.xlane.xlu0 %593  ;;  %v613_v22 = vmul.f32 0.0078125, %v602_v17 }
 0x23c   : > { %v609_v23 = vmul.f32 0.0078125, %v594_v21  ;;  %v628_v26 = vmul.f32 %v2055_v18, %v2055_v18 }
 0x23d   : > { %638 = vadd.xlane.f32.xlu1 %v627_v19  ;;  %632 = vadd.xlane.f32.xlu0 %v624_v20  ;;  %v2065_v28 = vsub.f32 %v588_v61, %v613_v22 }
 0x23e   : > { %v606_v24 = vpop.xlane.xlu1 %605  ;;  %v2061_v25 = vsub.f32 %v584_v0, %v609_v23 }
 0x23f   : > { %v604_v27 = vpop.xlane.xlu0 %603  ;;  %v615_v29 = vmul.f32 0.0078125, %v606_v24  ;;  %v629_v34 = vmul.f32 %v2065_v28, %v2065_v28 }
 0x240   : > { %v614_v30 = vmul.f32 0.0078125, %v604_v27  ;;  %v625_v31 = vmul.f32 %v2061_v25, %v2061_v25 }
 0x241   : > { %640 = vadd.xlane.f32.xlu0 %v628_v26  ;;  %v2071_v33 = vsub.f32 %v590_v3, %v615_v29  ;;  %v1069_v3 = vld [vmem:[%s2267_s21] ss:$0 sm:$0xff] }
 0x242   : > { %v2069_v32 = vsub.f32 %v589_v4, %v614_v30  ;;  %634 = vadd.xlane.f32.xlu1 %v625_v31 }
 0x243   : > { %v631_v36 = vmul.f32 %v2071_v33, %v2071_v33 }
 0x244   : > { %v630_v35 = vmul.f32 %v2069_v32, %v2069_v32 }
 0x246   : > { %642 = vadd.xlane.f32.xlu1 %v629_v34  ;;  %644 = vadd.xlane.f32.xlu0 %v630_v35 }
 0x24a   : > { %646 = vadd.xlane.f32.xlu1 %v631_v36 }
 0x2c6   : > { %v637_v37 = vpop.xlane.xlu0 %636 }
 0x2c7   : > { %v650_v38 = vmul.f32 0.0078125, %v637_v37 }
 0x2c9   : > { %v658_v39 = vadd.f32 1e-05, %v650_v38 }
 0x2ca   : > { %v639_v40 = vpop.xlane.xlu1 %638  ;;  %v633_v41 = vpop.xlane.xlu0 %632 }
 0x2cb   : > { %1406 = vrsqrt.f32 %v658_v39  ;;  %v651_v42 = vmul.f32 0.0078125, %v639_v40  ;;  %v648_v43 = vmul.f32 0.0078125, %v633_v41 }
 0x2cd   : > { %v659_v44 = vadd.f32 1e-05, %v651_v42  ;;  %v656_v45 = vadd.f32 1e-05, %v648_v43 }
 0x2ce   : > { %v641_v46 = vpop.xlane.xlu0 %640 }
 0x2cf   : > { %1408 = vrsqrt.f32 %v659_v44  ;;  %v652_v47 = vmul.f32 0.0078125, %v641_v46  ;;  %v635_v48 = vpop.xlane.xlu1 %634 }
 0x2d0   : > { %1410 = vrsqrt.f32 %v656_v45  ;;  %v649_v50 = vmul.f32 0.0078125, %v635_v48 }
 0x2d1   : > { %v660_v49 = vadd.f32 1e-05, %v652_v47 }
 0x2d2   : > { %v657_v51 = vadd.f32 1e-05, %v649_v50 }
 0x2d3   : > { %1412 = vrsqrt.f32 %v660_v49  ;;  %v643_v52 = vpop.xlane.xlu1 %642  ;;  %v645_v53 = vpop.xlane.xlu0 %644 }
 0x2d4   : > { %1414 = vrsqrt.f32 %v657_v51  ;;  %v653_v55 = vmul.f32 0.0078125, %v643_v52  ;;  %v654_v56 = vmul.f32 0.0078125, %v645_v53 }
 0x2d5   : > { %v1407_v54 = vpop.eup %1406 }
 0x2d6   : > { %v674_v57 = vmul.f32 %v1407_v54, %v618_v8  ;;  %v661_v59 = vadd.f32 1e-05, %v653_v55  ;;  %v662_v60 = vadd.f32 1e-05, %v654_v56 }
 0x2d7   : > { %v647_v61 = vpop.xlane.xlu1 %646 }
 0x2d8   : > { %1416 = vrsqrt.f32 %v661_v59  ;;  %v655_v63 = vmul.f32 0.0078125, %v647_v61  ;;  %v689_v1 = vmul.f32 %v1068_v58, %v674_v57 }
 0x2d9   : > { %v1409_v62 = vpop.eup %1408  ;;  %1418 = vrsqrt.f32 %v662_v60 }
 0x2da   : > { %v1411_v0 = vpop.eup %1410  ;;  %v675_v2 = vmul.f32 %v1409_v62, %v2053_v15  ;;  %v663_v4 = vadd.f32 1e-05, %v655_v63  ;;  %v704_v8 = vadd.f32 %v1069_v3, %v689_v1 }
 0x2db   : > { %v672_v6 = vmul.f32 %v1411_v0, %v2051_v11 }
 0x2dc   : > { %v690_v5 = vmul.f32 %v1068_v58, %v675_v2  ;;  %1420 = vrsqrt.f32 %v663_v4 }
 0x2dd   : > { %v1413_v7 = vpop.eup %1412  ;;  %v687_v13 = vmul.f32 %v1068_v58, %v672_v6 }
 0x2de   : > { %v705_v9 = vadd.f32 %v1069_v3, %v690_v5  ;;  %v1415_v10 = vpop.eup %1414  ;;  %v676_v14 = vmul.f32 %v1413_v7, %v2055_v18 }
 0x2df   : > { %v673_v15 = vmul.f32 %v1415_v10, %v2061_v25  ;;  %v702_v20 = vadd.f32 %v1069_v3, %v687_v13 }
 0x2e0   : > { %v711_v12 = vpack.c.bf16 %v705_v9, %v704_v8  ;;  %v691_v21 = vmul.f32 %v1068_v58, %v676_v14 }
 0x2e1   : > { %v688_v16 = vmul.f32 %v1068_v58, %v673_v15 }
 0x2e2   : > { %715 = vst [vmem:[#allocation2 + $0x8] sm:$0xff] %v711_v12  ;;  %v1417_v17 = vpop.eup %1416  ;;  %v706_v29 = vadd.f32 %v1069_v3, %v691_v21 }
 0x2e3   : > { %v1419_v19 = vpop.eup %1418  ;;  %v703_v22 = vadd.f32 %v1069_v3, %v688_v16  ;;  %v677_v11 = vmul.f32 %v1417_v17, %v2065_v28 }
 0x2e4   : > { %v678_v23 = vmul.f32 %v1419_v19, %v2069_v32 }
 0x2e5   : > { %v710_v24 = vpack.c.bf16 %v703_v22, %v702_v20  ;;  %v692_v26 = vmul.f32 %v1068_v58, %v677_v11 }
 0x2e6   : > { %v1421_v27 = vpop.eup %1420  ;;  %v693_v18 = vmul.f32 %v1068_v58, %v678_v23 }
 0x2e7   : > { %714 = vst [vmem:[#allocation2] sm:$0xff] %v710_v24  ;;  %v707_v30 = vadd.f32 %v1069_v3, %v692_v26  ;;  %v679_v25 = vmul.f32 %v1421_v27, %v2071_v33 }
 0x2e8   : > { %v708_v35 = vadd.f32 %v1069_v3, %v693_v18 }
 0x2e9   : > { %v712_v31 = vpack.c.bf16 %v707_v30, %v706_v29  ;;  %v694_v34 = vmul.f32 %v1068_v58, %v679_v25 }
 0x2eb   : > { %716 = vst [vmem:[#allocation2 + $0x10] sm:$0xff] %v712_v31  ;;  %v709_v36 = vadd.f32 %v1069_v3, %v694_v34 }
 0x2ed   : > { %v713_v37 = vpack.c.bf16 %v709_v36, %v708_v35 }
 0x2ef   : > { %717 = vst [vmem:[#allocation2 + $0x18] sm:$0xff] %v713_v37 }
 0x2f0 PF: > { %v1422_v28 = vld [vmem:[%s2024_s11] sm:$0xff]   ;;  %v1423_v32 = vld [vmem:[%s2024_s11 + $0x8] sm:$0xff]   ;;  %v1424_v33 = vld [vmem:[%s2024_s11 + $0x10] sm:$0xff]   ;;  %s2268_s0 = sld [smem:[#allocation17_spill]]  ;;  %s2269_s7 = sld [smem:[#allocation16_spill]] }
 0x2f1   : > { %1173 = vmatprep.subr.bf16.mxu0 %v1422_v28  ;;  %1213 = vmatprep.subr.bf16.mxu1 %v1422_v28  ;;  %v1425_v38 = vld [vmem:[%s2024_s11 + $0x18] sm:$0xff]   ;;  %v718_v39 = vld [vmem:[#allocation2] sm:$0xff]  ;;  %v1427_v42 = vld [vmem:[%s2024_s11 + $0x28] sm:$0xff]   ;;  %s914_s30 = sshll.u32 %s2041_s18, 4  ;;  %s2271_s13 = sld [smem:[#allocation30_spill]]  ;;  %s2113_s30 = int_to_ptr.vmem [resolvable:$true] %s914_s30 }
 0x2f2   : > { %1174 = vmatpush3.bf16.msra.mxu0 %v1422_v28  ;;  %1221 = vmatpush3.bf16.msra.mxu1 %v1422_v28  ;;  %v720_v40 = vld [vmem:[#allocation2 + $0x10] sm:$0xff]  ;;  %v1426_v41 = vld [vmem:[%s2024_s11 + $0x20] sm:$0xff]   ;;  %v1429_v44 = vld [vmem:[%s2024_s11 + $0x38] sm:$0xff]   ;;  %s2121_s4 = scalar_lea.sflag [#allocation5], %s370_s20  ;;  %s1518_s2 = scalar_lea.vmem %s2113_s30, 512 }
 0x2f3   : > { %1175 = vmatprep.subr.bf16.mxu0 %v1423_v32  ;;  %1214 = vmatprep.subr.bf16.mxu1 %v1423_v32  ;;  %v1428_v43 = vld [vmem:[%s2024_s11 + $0x30] sm:$0xff]   ;;  %v719_v45 = vld [vmem:[#allocation2 + $0x8] sm:$0xff]  ;;  %v1070_v48 = vld [vmem:[%s376_s23] ss:$0 sm:$0xff]  ;;  %p1519_p11 = scmp.ne.s32.totalorder %s2113_s30, %s1518_s2  ;;  %p2273_p9 = scmp.ne.s32.totalorder %s2249_s27, 0 }
 0x2f4   : > { %1189 = vmatprep.mubr.bf16.mxu0 %v718_v39  ;;  %1193 = vmatprep.mubr.bf16.mxu1 %v720_v40  ;;  %s1680_s10 = smov [#allocation9]  }
 0x2f5   : > { %p1520_p12 = pnand %p1519_p11, %p2273_p9  ;;  %s1522_s22 = sshll.u32 %s1680_s10, 4  ;;  %s1523_s22 = int_to_ptr.vmem [resolvable:$false] %s1522_s22 }
 0x2f6   : > { %1176 = vmatpush3.bf16.msra.mxu0 %v1423_v32  ;;  %1222 = vmatpush3.bf16.msra.mxu1 %v1423_v32  ;;  %v721_v46 = vld [vmem:[#allocation2 + $0x18] sm:$0xff]  ;;  %s1229_s17 = smul.u32 24, %s2268_s0  ;;  %s1524_s21 = scalar_lea.vmem %s1523_s22, 1024 }
 0x2f7   : > { %1177 = vmatprep.subr.bf16.mxu0 %v1424_v33  ;;  %1215 = vmatprep.subr.bf16.mxu1 %v1424_v33  ;;  %s2272_s15 = smov %s2271_s13  ;;  %p1521_p6 = pneg %p1520_p12 }
 0x2f8   : > { %s911_s6 = sadd.s32 %s2269_s7, %s1229_s17  ;;  %p1525_p5 = scmp.lt.s32.totalorder %s2113_s30, %s1523_s22 }
 0x2f9   : > { %s1090_s11 = sshll.u32 %s911_s6, 6  ;;  %p1526_p4 = scmp.lt.s32.totalorder %s1524_s21, %s1518_s2 }
 0x2fa   : > { %1178 = vmatpush3.bf16.msra.mxu0 %v1424_v33  ;;  %1223 = vmatpush3.bf16.msra.mxu1 %v1424_v33  ;;  %s2111_s12 = scalar_lea.hbm %s2271_s13, %s1090_s11 }
 0x2fb   : > { %1179 = vmatprep.subr.bf16.mxu0 %v1425_v38  ;;  %1216 = vmatprep.subr.bf16.mxu1 %v1425_v38  ;;  %p1527_p10 = por %p1526_p4, %p1525_p5 }
 0x2fd   : > { %p1528_p8 = pnand %p1527_p10, %p1521_p6 }
 0x2fe   : > { %1180 = vmatpush3.bf16.msra.mxu0 %v1425_v38  ;;  %1224 = vmatpush3.bf16.msra.mxu1 %v1425_v38 }
 0x2ff   : > { %1181 = vmatprep.subr.bf16.mxu0 %v1426_v41  ;;  %1217 = vmatprep.subr.bf16.mxu1 %v1426_v41 }
 0x302   : > { %1182 = vmatpush3.bf16.msra.mxu0 %v1426_v41  ;;  %1225 = vmatpush3.bf16.msra.mxu1 %v1426_v41 }
 0x303   : > { %1183 = vmatprep.subr.bf16.mxu0 %v1427_v42  ;;  %1218 = vmatprep.subr.bf16.mxu1 %v1427_v42 }
 0x306   : > { %1184 = vmatpush3.bf16.msra.mxu0 %v1427_v42  ;;  %1226 = vmatpush3.bf16.msra.mxu1 %v1427_v42 }
 0x307   : > { %1185 = vmatprep.subr.bf16.mxu0 %v1428_v43  ;;  %1219 = vmatprep.subr.bf16.mxu1 %v1428_v43 }
 0x30a   : > { %1186 = vmatpush3.bf16.msra.mxu0 %v1428_v43  ;;  %1227 = vmatpush3.bf16.msra.mxu1 %v1428_v43 }
 0x30b   : > { %1187 = vmatprep.subr.bf16.mxu0 %v1429_v44  ;;  %1220 = vmatprep.subr.bf16.mxu1 %v1429_v44 }
 0x30e   : > { %1188 = vmatpush3.bf16.msra.mxu0 %v1429_v44  ;;  %1228 = vmatpush3.bf16.msra.mxu1 %v1429_v44 }
 0x311   : > { %1190 = vmatmul.mubr.bf16.vlgmr.msra.gmra.mrb[0].mxu0 %v719_v45  ;;  %1194 = vmatmul.mubr.bf16.vlgmr.msra.gmra.mrb[0].mxu1 %v721_v46 }
 0x3e4   : > { %v1191_v47 = vpop.f32.mrb[0].mxu0  ;;  %v1195_v49 = vpop.f32.mrb[0].mxu1 }
 0x3e5   : > { %v827_v50 = vpop.f32.mrb[1].mxu0  ;;  %v843_v51 = vpop.f32.mrb[1].mxu1  ;;  %v836_v54 = vadd.f32 %v1191_v47, %v1070_v48  ;;  %v852_v55 = vadd.f32 %v1195_v49, %v1070_v48 }
 0x3e6   : > { %v1192_v52 = vpop.f32.mrb[2].mxu0  ;;  %v1196_v53 = vpop.f32.mrb[2].mxu1  ;;  %v828_v60 = vadd.f32 %v1070_v48, %v827_v50  ;;  %v844_v61 = vadd.f32 %v1070_v48, %v843_v51 }
 0x3e7   : > { %v839_v56 = vadd.f32 %v1192_v52, %v1070_v48  ;;  %v855_v57 = vadd.f32 %v1196_v53, %v1070_v48  ;;  %v830_v58 = vpop.f32.mrb[3].mxu0  ;;  %v846_v59 = vpop.f32.mrb[3].mxu1 }
 0x3e8   : > { %v831_v62 = vadd.f32 %v1070_v48, %v830_v58  ;;  %v847_v63 = vadd.f32 %v1070_v48, %v846_v59 }
 0x3e9   : > { %v1110_v0 = vpack.c.bf16 %v839_v56, %v836_v54  ;;  %v1120_v1 = vpack.c.bf16 %v855_v57, %v852_v55 }
 0x3ea   : > { %v1105_v2 = vpack.c.bf16 %v831_v62, %v828_v60  ;;  %v1115_v3 = vpack.c.bf16 %v847_v63, %v844_v61 }
 0x3eb   : > { %1122 = vst [vmem:[%s2041_s18 + $0x8] sm:$0xff] %v1110_v0   ;;  %1124 = vst [vmem:[%s2041_s18 + $0x18] sm:$0xff] %v1120_v1  }
 0x3ec   : > { %1106 = vst [vmem:[%s2041_s18] sm:$0xff] %v1105_v2   ;;  %1123 = vst [vmem:[%s2041_s18 + $0x10] sm:$0xff] %v1115_v3  }
 0x3ed   : > { %1531 = shalt.err (!%p1528_p8)
}
 0x3ee   : > { %s1532_s20 = scalar_lea.hbm %s2111_s12, 512  ;;  %s1536_s7 = scalar_lea.hbm %s2272_s15, 3072 }
 0x3ef   : > { %p1533_p2 = scmp.ne.s32.totalorder %s2111_s12, %s1532_s20  ;;  %p1537_p7 = scmp.lt.u32.totalorder %s2111_s12, %s2272_s15 }
 0x3f0   : > { %p1538_p1 = scmp.lt.u32.totalorder %s1536_s7, %s1532_s20  ;;  %p1540_p11 = scmp.lt.u32.totalorder %s1532_s20, %s2111_s12 }
 0x3f1   : > { %p1534_p0 = pnand %p1533_p2, %p2273_p9 }
 0x3f2   : > { %p1539_p3 = por %p1538_p1, %p1537_p7 }
 0x3f3   : > { %p1535_p13 = pneg %p1534_p0 }
 0x3f4   : > { %p1541_p12 = por %p1540_p11, %p1539_p3 }
 0x3f6   : > { %p1542_p6 = pnand %p1541_p12, %p1535_p13 }
 0x3f8   : > { %1545 = shalt.err (!%p1542_p6)
}
 0x3f9   : > { %s1681_s29 = smov 64   ;;  %s1682_s9 = smov 192  }
 0x3fa   : > { %s1683_s16 = smov 4  }
 0x3fb   : > { %1238 = dma.vmem_to_hbm [thread:$0]  (%p2273_p9), %s2113_s30, 512, %s2111_s12, %s2121_s4, %s1681_s29, %s1682_s9, %s1683_s16  }
 0x3fc PF: > { %p1258_p5 = scmp.ge.s32.totalorder %s1672_s14, 2  ;;  %s929_s11 = sand.u32 1, %s1620_s24  }
 0x3fd   : > { %p2274_p4 = scmp.ne.s32.totalorder %s2250_s19, 0  ;;  %s930_s3 = scalar_lea.sflag [#allocation5], %s929_s11 }
 0x3ff   : > { %p1252_p10 = pnand %p1258_p5, %p2274_p4 }
 0x401   : > { %1615 = dma.done.wait (!%p1252_p10), %s930_s3, 512  }
 0x402   : > { %1617 = vsyncadd (!%p1252_p10), %s930_s3, 4294966784  ;;  %s24_s14 = sadd.s32 1, %s1672_s14   ;;  %s2276_s27 = sld [smem:[#allocation23_spill]] }
 0x403   : > { %p2150_p8 = scmp.ge.s32.totalorder %s24_s14, 8   ;;  %s2277_s30 = sld [smem:[#allocation14_spill]] }
 0x404   : > { %s2278_s29 = sld [smem:[#allocation24_spill]]  ;;  %s2279_s13 = sld [smem:[#allocation15_spill]] }
 0x405   : > { %s2280_s9 = sld [smem:[#allocation22_spill]]  ;;  %s2281_s10 = sld [smem:[#allocation18_spill]] }
 0x406   : > { %s2282_s11 = sld [smem:[#allocation19_spill]]  ;;  %s2283_s12 = sld [smem:[#allocation20_spill]] }
 0x407   : > { %s2284_s19 = sld [smem:[#allocation21_spill]]  ;;  %s2285_s24 = smov %s1624_s25 }
 0x408   : > { %s2286_s25 = smov %s1628_s26  ;;  %s2287_s26 = smov %s2276_s27 }
 0x409   : > { %s2288_s27 = smov %s1636_s28  ;;  %s2289_s28 = smov %s2277_s30 }
 0x40a   : > { %s2290_s30 = smov %s1648_s8  ;;  %s2291_s8 = smov %s2279_s13 }
 0x40b   :  { %23 = sbr.rel (!%p2150_p8) target bundleno = 18 (0x12), region = 115 }
 0x40d   : > { %s2292_s13 = smov %s2284_s19 }
 0x412   :  { %935 = vsyncpa [#allocation4], 1 }
 0x413   :  { %937 = vsyncpa [#allocation4 + $0x1], 1 }
 0x414   :  { %938 = vsyncpa [#allocation7], 1 }
 0x415   :  { %939 = vsyncpa [#allocation5], 1 }
 0x416   :  { %941 = vsyncpa [#allocation5 + $0x1], 1 }

</bundles_post_ra>
